<compile_context>
chip_gen: v6e
topology: v6e:2x2x1
jax: 0.10.0
libtpu: 0.0.40
codegen_flags: <defaults>
</compile_context>

<pallas_src>
import functools

import jax
import jax.numpy as jnp
from jax.experimental import pallas as pl
from jax.experimental.pallas import tpu as pltpu


def _conv2d_cd_kernel(x_ref, w_ref, o_ref, *, th, w_out, cin):
    # x_ref: (H+2, W+2, Cin)      padded NHWC image for one batch element
    #                             (same block for every row-tile -> stays resident)
    # w_ref: (9*Cin, Cout_pad)    CD-folded, lane-padded weight matrix (resident)
    # o_ref: (TH*W, Cout_pad)     flattened output rows for this (batch, row-tile)
    r = pl.program_id(1)
    row0 = pl.multiple_of(r * th, th)

    # Load TH output rows plus the 2-row conv halo.
    xt = x_ref[pl.ds(row0, th + 2), :, :]            # (TH+2, W+2, Cin)

    # im2col: 9 shifted taps, concatenated on the channel axis in (ky, kx, cin)
    # order to match the wrapper's weight reshape.
    taps = [
        xt[ky:ky + th, kx:kx + w_out, :].reshape(th * w_out, cin)
        for ky in range(3) for kx in range(3)
    ]
    patches = jnp.concatenate(taps, axis=1)          # (TH*W, 9*Cin)

    # Single MXU matmul, f32 accumulation, store in output dtype.
    o_ref[...] = jnp.dot(
        patches, w_ref[...], preferred_element_type=jnp.float32
    ).astype(o_ref.dtype)


def conv2d_cd(x_nchw, weight_oihw, theta: float = 0.7, *, row_tile: int = 8):
    """Central-difference conv. x: (N, Cin, H, W); weight: (Cout, Cin, 3, 3)."""
    N, Cin, H, W = x_nchw.shape
    Cout = weight_oihw.shape[0]
    assert weight_oihw.shape == (Cout, Cin, 3, 3)

    # --- weight prep (hoisted out of the kernel, done once) -----------------
    # Exact algebraic fold of the CD term:  W_cd = W ; W_cd[:,:,1,1] -= theta*sum(W)
    w_cd = weight_oihw.at[:, :, 1, 1].add(
        -jnp.asarray(theta, weight_oihw.dtype) * weight_oihw.sum(axis=(2, 3)))
    # (Cout, Cin, 3, 3) -> (ky, kx, Cin, Cout) -> (9*Cin, Cout), pad Cout to 128-lane.
    cout_pad = -(-Cout // 128) * 128
    w_mat = jnp.transpose(w_cd, (2, 3, 1, 0)).reshape(9 * Cin, Cout)
    w_mat = jnp.pad(w_mat, ((0, 0), (0, cout_pad - Cout))).astype(x_nchw.dtype)

    # --- layout glue: NCHW -> padded NHWC (transpose + pad fuse in XLA) -----
    x_pad = jnp.pad(jnp.transpose(x_nchw, (0, 2, 3, 1)),
                    ((0, 0), (1, 1), (1, 1), (0, 0)))       # (N, H+2, W+2, Cin)

    th = row_tile if (H % row_tile == 0) else H
    num_row_tiles = H // th

    kernel = functools.partial(_conv2d_cd_kernel, th=th, w_out=W, cin=Cin)

    # VMEM budget from actual block footprint (double-buffered), clamped so the
    # request is safe on v5e/v6e/v7x.
    itemsize = jnp.dtype(x_nchw.dtype).itemsize
    blk_in = (H + 2) * (W + 2) * Cin * itemsize
    blk_out = th * W * cout_pad * itemsize
    blk_w = 9 * Cin * cout_pad * itemsize
    vmem_bytes = int(min(96 << 20,
                         max(32 << 20, 2 * (blk_in + blk_out) + 2 * blk_w + (4 << 20))))

    out_flat = pl.pallas_call(
        kernel,
        out_shape=jax.ShapeDtypeStruct((N, H * W, cout_pad), x_nchw.dtype),
        grid=(N, num_row_tiles),
        in_specs=[
            # Full padded image per batch element; index ignores the row-tile
            # axis so the block is not re-DMA'd across row tiles.
            pl.BlockSpec((None, H + 2, W + 2, Cin), lambda n, r: (n, 0, 0, 0)),
            # Folded weight matrix, resident for the whole grid.
            pl.BlockSpec((9 * Cin, cout_pad), lambda n, r: (0, 0)),
        ],
        out_specs=pl.BlockSpec((None, th * W, cout_pad), lambda n, r: (n, r, 0)),
        compiler_params=pltpu.CompilerParams(
            dimension_semantics=("parallel", "parallel"),
            vmem_limit_bytes=vmem_bytes),
    )(x_pad, w_mat)

    # Back to the PyTorch NCHW interface (slice padded channels + reshape +
    # transpose fuse into one XLA pass).
    out = out_flat[:, :, :Cout].reshape(N, H, W, Cout).transpose(0, 3, 1, 2)
    return out


if __name__ == "__main__":
    key = jax.random.PRNGKey(0)
    k_x, k_w = jax.random.split(key)

    # Small shapes consistent with the module: batch=2, Cin=4, Cout=8, 16x16.
    N, Cin, Cout, H, W = 2, 4, 8, 16, 16
    theta = 0.7

    x = jax.random.normal(k_x, (N, Cin, H, W), dtype=jnp.float32)
    weight = jax.random.normal(k_w, (Cout, Cin, 3, 3), dtype=jnp.float32) * 0.1

    out = jax.jit(functools.partial(conv2d_cd, theta=theta))(x, weight)
    jax.block_until_ready(out)

    # Correctness check against a plain-JAX reference of the original
    # (un-folded) Conv2d_cd math.
    out_normal = jax.lax.conv_general_dilated(
        x, weight, window_strides=(1, 1), padding=((1, 1), (1, 1)),
        dimension_numbers=("NCHW", "OIHW", "NCHW"))
    kernel_diff = weight.sum(axis=(2, 3))[:, :, None, None]
    out_diff = jax.lax.conv_general_dilated(
        x, kernel_diff, window_strides=(1, 1), padding=((0, 0), (0, 0)),
        dimension_numbers=("NCHW", "OIHW", "NCHW"))
    ref = out_normal - theta * out_diff

    assert out.shape == (N, Cout, H, W)
    assert jnp.allclose(out, ref, atol=2e-4, rtol=2e-4), \
        float(jnp.max(jnp.abs(out - ref)))
    print("KERNEL_OK")
</pallas_src>

<mosaic_0001>
module attributes {stable_mosaic.version = 11 : i64} {
  func.func @_conv2d_cd_kernel(%arg0: i32, %arg1: i32, %arg2: memref<1x18x18x4xf32, #tpu.memory_space<vmem>>, %arg3: memref<36x128xf32, #tpu.memory_space<vmem>>, %arg4: memref<1x128x128xf32, #tpu.memory_space<vmem>>) attributes {dimension_semantics = [#tpu.dimension_semantics<parallel>, #tpu.dimension_semantics<parallel>], iteration_bounds = array<i64: 2, 2>, scalar_prefetch = 0 : i64, scratch_operands = 0 : i64, tpu.core_type = #tpu.core_type<tc>, window_params = [{transform_indices = @transform_0, window_bounds = array<i64: 1, 18, 18, 4>}, {pipeline_mode = #tpu.pipeline_mode<synchronous>, transform_indices = @transform_1, window_bounds = array<i64: 36, 128>}, {transform_indices = @transform_2, window_bounds = array<i64: 1, 128, 128>}]} {
    %c8_i32 = arith.constant 8 : i32
    %0 = arith.muli %arg1, %c8_i32 : i32
    %1 = tpu.assume_multiple %0, 8 : i32
    %c0 = arith.constant 0 : index
    %2 = arith.index_cast %1 : i32 to index
    %c0_0 = arith.constant 0 : index
    %c0_1 = arith.constant 0 : index
    %3 = vector.load %arg2[%c0, %2, %c0_0, %c0_1] : memref<1x18x18x4xf32, #tpu.memory_space<vmem>>, vector<1x10x18x4xf32>
    %4 = vector.shape_cast %3 : vector<1x10x18x4xf32> to vector<10x18x4xf32>
    %5 = vector.extract_strided_slice %4 {offsets = [0, 0, 0], sizes = [8, 16, 4], strides = [1, 1, 1]} : vector<10x18x4xf32> to vector<8x16x4xf32>
    %6 = vector.shape_cast %5 : vector<8x16x4xf32> to vector<128x4xf32>
    %7 = vector.extract_strided_slice %4 {offsets = [0, 1, 0], sizes = [8, 16, 4], strides = [1, 1, 1]} : vector<10x18x4xf32> to vector<8x16x4xf32>
    %8 = vector.shape_cast %7 : vector<8x16x4xf32> to vector<128x4xf32>
    %9 = vector.extract_strided_slice %4 {offsets = [0, 2, 0], sizes = [8, 16, 4], strides = [1, 1, 1]} : vector<10x18x4xf32> to vector<8x16x4xf32>
    %10 = vector.shape_cast %9 : vector<8x16x4xf32> to vector<128x4xf32>
    %11 = vector.extract_strided_slice %4 {offsets = [1, 0, 0], sizes = [8, 16, 4], strides = [1, 1, 1]} : vector<10x18x4xf32> to vector<8x16x4xf32>
    %12 = vector.shape_cast %11 : vector<8x16x4xf32> to vector<128x4xf32>
    %13 = vector.extract_strided_slice %4 {offsets = [1, 1, 0], sizes = [8, 16, 4], strides = [1, 1, 1]} : vector<10x18x4xf32> to vector<8x16x4xf32>
    %14 = vector.shape_cast %13 : vector<8x16x4xf32> to vector<128x4xf32>
    %15 = vector.extract_strided_slice %4 {offsets = [1, 2, 0], sizes = [8, 16, 4], strides = [1, 1, 1]} : vector<10x18x4xf32> to vector<8x16x4xf32>
    %16 = vector.shape_cast %15 : vector<8x16x4xf32> to vector<128x4xf32>
    %17 = vector.extract_strided_slice %4 {offsets = [2, 0, 0], sizes = [8, 16, 4], strides = [1, 1, 1]} : vector<10x18x4xf32> to vector<8x16x4xf32>
    %18 = vector.shape_cast %17 : vector<8x16x4xf32> to vector<128x4xf32>
    %19 = vector.extract_strided_slice %4 {offsets = [2, 1, 0], sizes = [8, 16, 4], strides = [1, 1, 1]} : vector<10x18x4xf32> to vector<8x16x4xf32>
    %20 = vector.shape_cast %19 : vector<8x16x4xf32> to vector<128x4xf32>
    %21 = vector.extract_strided_slice %4 {offsets = [2, 2, 0], sizes = [8, 16, 4], strides = [1, 1, 1]} : vector<10x18x4xf32> to vector<8x16x4xf32>
    %22 = vector.shape_cast %21 : vector<8x16x4xf32> to vector<128x4xf32>
    %23 = tpu.concatenate %6, %8, %10, %12, %14, %16, %18, %20, %22 in 1 : vector<128x4xf32>, vector<128x4xf32>, vector<128x4xf32>, vector<128x4xf32>, vector<128x4xf32>, vector<128x4xf32>, vector<128x4xf32>, vector<128x4xf32>, vector<128x4xf32> -> vector<128x36xf32>
    %c0_2 = arith.constant 0 : index
    %c0_3 = arith.constant 0 : index
    %24 = vector.load %arg3[%c0_2, %c0_3] : memref<36x128xf32, #tpu.memory_space<vmem>>, vector<36x128xf32>
    %cst = arith.constant dense<0.000000e+00> : vector<128x128xf32>
    %25 = tpu.matmul %23, %24, %cst {dimension_numbers = #tpu.dot_dimension_numbers<[1], [0], [0], [1], [0, 0, 1, 1], [], []>} : vector<128x36xf32>, vector<36x128xf32>, vector<128x128xf32> -> vector<128x128xf32>
    %c0_4 = arith.constant 0 : index
    %c0_5 = arith.constant 0 : index
    %c0_6 = arith.constant 0 : index
    %26 = vector.load %arg4[%c0_4, %c0_5, %c0_6] : memref<1x128x128xf32, #tpu.memory_space<vmem>>, vector<1x128x128xf32>
    %27 = vector.shape_cast %26 : vector<1x128x128xf32> to vector<128x128xf32>
    %28 = vector.shape_cast %25 : vector<128x128xf32> to vector<1x128x128xf32>
    tpu.vector_store %arg4[%c0_4, %c0_5, %c0_6], %28 {strides = array<i32>} : memref<1x128x128xf32, #tpu.memory_space<vmem>>, vector<1x128x128xf32>,
    return
  }
  func.func @transform_0(%arg0: i32, %arg1: i32) -> (i32, i32, i32, i32) {
    %c0_i32 = arith.constant 0 : i32
    %c0_i32_0 = arith.constant 0 : i32
    %c0_i32_1 = arith.constant 0 : i32
    %c0_i32_2 = arith.constant 0 : i32
    return %arg0, %c0_i32, %c0_i32_0, %c0_i32_1 : i32, i32, i32, i32
  }
  func.func @transform_1(%arg0: i32, %arg1: i32) -> (i32, i32) {
    %c0_i32 = arith.constant 0 : i32
    %c0_i32_0 = arith.constant 0 : i32
    %c0_i32_1 = arith.constant 0 : i32
    return %c0_i32, %c0_i32_0 : i32, i32
  }
  func.func @transform_2(%arg0: i32, %arg1: i32) -> (i32, i32, i32) {
    %c0_i32 = arith.constant 0 : i32
    %c0_i32_0 = arith.constant 0 : i32
    return %arg0, %arg1, %c0_i32 : i32, i32, i32
  }
}

</mosaic_0001>

<bundles_post_ra>
// kernel: conv2d_cd.1
= control target key start
LH: loop header
LB: loop body
LE: loop exit
PB: predicated region body
PF: predicated region fallthrough
CT: control target
= control target key end

     0   :  { %s1364_s9 = smov 0   ;;  %s1366_s10 = smov 0   ;;  %s2084_s0 = inlined_call_operand.vmem [shape: f32[2,18,18,4], index: 0, kind: input, shape index: {}]   ;;  %s2085_s1 = inlined_call_operand.vmem [shape: f32[36,128], index: 1, kind: input, shape index: {}]   ;;  %s2086_s2 = inlined_call_operand.vmem [shape: f32[2,256,128], index: 2, kind: output, shape index: {}]  }
   0x1   :  { %s1368_s11 = smov 0   ;;  %s1370_s12 = smov 0  }
   0x2   :  { %s1372_s13 = smov 0  }
   0x3 LB: > { %s21_s14 = sadd.s32 1, %s1331_s11  ;;  %s24_s15 = sadd.s32 1, %s1335_s12  ;;  %s1339_s13 = sphi %s1372_s13, %s12_s13   ;;  %s1335_s12 = sphi %s1370_s12, %s2117_s12   ;;  %s1331_s11 = sphi %s1368_s11, %s2116_s11   ;;  %s1327_s10 = sphi %s1366_s10, %s2115_s10   ;;  %s1323_s9 = sphi %s1364_s9, %s2114_s9  }
   0x4   : > { %p22_p0 = scmp.ge.s32.totalorder %s21_s14, 2  ;;  %p1161_p1 = scmp.ge.s32.totalorder %s1339_s13, 1 }
   0x5   : > { %p126_p2 = scmp.lt.s32.totalorder %s1339_s13, 5 }
   0x6   : > { %s2119_s14 = smov (%p22_p0, %s21_s14), 0  ;;  %s2121_s15 = smov (!%p22_p0, %s24_s15), %s1335_s12 }
   0x7   : > { %p127_p3 = pnand %p1161_p1, %p126_p2  ;;  %p26_p4 = scmp.ge.s32.totalorder %s2121_s15, 2 }
   0x9   : > { %s2123_s15 = smov (%p26_p4, %s2121_s15), 0  ;;  %130 = sbr.rel (%p127_p3) target bundleno = 590 (0x24e), region = 28 }
   0xe   : > { %p152_p5 = scmp.lt.s32.totalorder %s1327_s10, 1  ;;  %s1167_s16 = smul.u32 192, %s1323_s9  ;;  %vm224_vm0 = vcmask 1046528   ;;  %vm265_vm1 = vcmask 1045504   ;;  %vm906_vm2 = vcmask 1043456   ;;  %vm716_vm3 = vcmask 31744  }
   0xf   : > { %s1341_s22 = smov 4   ;;  %s1342_s23 = smov 8   ;;  %vm733_vm4 = vcmask 64512   ;;  %vm750_vm5 = vcmask 97280   ;;  %vm767_vm6 = vcmask 130048   ;;  %vm784_vm7 = vcmask 162816  }
  0x10   : > { %s2125_s10 = smov (!%p152_p5, %s1327_s10), 1  ;;  %s1343_s24 = smov 12   ;;  %vm801_vm8 = vcmask 195584   ;;  %vm818_vm9 = vcmask 228352   ;;  %vm835_vm10 = vcmask 261120   ;;  %vm857_vm11 = vcmask 293888  }
  0x11   : > { %s1252_s17 = smul.u32 432, %s2125_s10  ;;  %s1344_s25 = smov 16  }
  0x12   : > { %s1345_s26 = smov 20   ;;  %s1346_s27 = smov 24  }
  0x13   : > { %s156_s20 = scalar_lea.vmem %s2084_s0, %s1252_s17  ;;  %s1347_s28 = smov 28  }
  0x14   : > { %s1403_s21 = scalar_lea.vmem %s156_s20, %s1167_s16  ;;  %s1348_s16 = smov 32  }
  0x15   : > { %v1406_v0 = vld [vmem:[%s1403_s21 + $0x8] sm:$0xff]  ;;  %v172_v1 = vld [vmem:[%s1403_s21 + $0x10] sm:$0x3]  ;;  %v1410_v2 = vld [vmem:[%s1403_s21] sm:$0xff]  ;;  %s1163_s19 = sshll.u32 %s1323_s9, 4  ;;  %s1164_s20 = sshll.u32 %s2125_s10, 5 }
  0x16   : > { %v226_v3 = vrot.slane %v1406_v0, 1  ;;  %v228_v4 = vrot.slane %v172_v1, 1  ;;  %v225_v5 = vrot.slane %v1410_v2, 1  ;;  %v1415_v6 = vld [vmem:[%s1403_s21 + $0x68] sm:$0xff]  ;;  %v184_v7 = vld [vmem:[%s1403_s21 + $0x70] sm:$0x3] }
  0x17   : > { %v246_v8 = vrot.slane %v1415_v6, 1  ;;  %v248_v9 = vrot.slane %v184_v7, 1  ;;  %v1420_v10 = vld [vmem:[%s1403_s21 + $0x60] sm:$0xff]  ;;  %v287_v14 = vrot.slane %v1415_v6, 2  ;;  %v266_v15 = vrot.slane %v1410_v2, 2  ;;  %v1456_v26 = vld [vmem:[%s1403_s21 + $0x78] sm:$0xff] }
  0x18   : > { %v229_v11 = vsel %vm224_vm0, %v226_v3, %v228_v4  ;;  %v227_v12 = vsel %vm224_vm0, %v225_v5, %v226_v3  ;;  %v245_v13 = vrot.slane %v1420_v10, 1  ;;  %v286_v18 = vrot.slane %v1420_v10, 2  ;;  %v1459_v27 = vld [vmem:[%s1403_s21 + $0x18] sm:$0xff]  ;;  %v1462_v28 = vld [vmem:[%s1403_s21 + $0x80] sm:$0xff]  ;;  %v187_v36 = vld [vmem:[%s1403_s21 + $0x88] sm:$0x3] }
  0x19   : > { %334 = vrot.lane.b32.xlu1 %v229_v11, %s1341_s22  ;;  %332 = vrot.lane.b32.xlu0 %v227_v12, %s1341_s22  ;;  %v1430_v16 = vsel %vm224_vm0, %v246_v8, %v248_v9  ;;  %v267_v19 = vrot.slane %v1406_v0, 2  ;;  %v289_v22 = vrot.slane %v184_v7, 2  ;;  %v269_v23 = vrot.slane %v172_v1, 2  ;;  %v1465_v29 = vld [vmem:[%s1403_s21 + $0x20] sm:$0xff]  ;;  %v175_v37 = vld [vmem:[%s1403_s21 + $0x28] sm:$0x3] }
  0x1a   : > { %v1433_v17 = vsel %vm224_vm0, %v245_v13, %v246_v8  ;;  %v1442_v20 = vsel %vm265_vm1, %v286_v18, %v287_v14  ;;  %v250_v30 = vrot.slane %v1456_v26, 1  ;;  %v251_v31 = vrot.slane %v1462_v28, 1  ;;  %v1523_v52 = vld [vmem:[%s1403_s21 + $0x90] sm:$0xff]  ;;  %v1536_v54 = vld [vmem:[%s1403_s21 + $0x98] sm:$0xff]  ;;  %v190_v62 = vld [vmem:[%s1403_s21 + $0xa0] sm:$0x3] }
  0x1b   : > { %v268_v21 = vsel %vm265_vm1, %v266_v15, %v267_v19  ;;  %v1449_v24 = vsel %vm265_vm1, %v287_v14, %v289_v22  ;;  %v270_v25 = vsel %vm265_vm1, %v267_v19, %v269_v23  ;;  %v230_v32 = vrot.slane %v1459_v27, 1  ;;  %v1526_v53 = vld [vmem:[%s1403_s21 + $0x30] sm:$0xff]  ;;  %v1539_v55 = vld [vmem:[%s1403_s21 + $0x38] sm:$0xff]  ;;  %v178_v63 = vld [vmem:[%s1403_s21 + $0x40] sm:$0x3]  ;;  %p160_p6 = scmp.lt.s32.totalorder %s1163_s19, 31 }
  0x1c   : > { %v231_v33 = vrot.slane %v1465_v29, 1  ;;  %v1480_v34 = vsel %vm224_vm0, %v250_v30, %v251_v31  ;;  %v253_v38 = vrot.slane %v187_v36, 1  ;;  %v233_v39 = vrot.slane %v175_v37, 1  ;;  %2100 = vst [vmem:[#allocation6_spill] sm:$0xff] %v1539_v55  ;;  %v856_v12 = vld [vmem:[%s2085_s1 + $0x20] sm:$0xf] }
  0x1d   : > { %350 = vrot.lane.b32.xlu1 %v1430_v16, %s1341_s22  ;;  %348 = vrot.lane.b32.xlu0 %v1433_v17, %s1341_s22  ;;  %2096 = vst [vmem:[#allocation2_spill] sm:$0xff] %v1480_v34  ;;  %v291_v40 = vrot.slane %v1456_v26, 2  ;;  %v292_v41 = vrot.slane %v1462_v28, 2  ;;  %v271_v44 = vrot.slane %v1459_v27, 2  ;;  %v272_v45 = vrot.slane %v1465_v29, 2  ;;  %v855_v13 = vld [vmem:[%s2085_s1 + $0x18] sm:$0xff] }
  0x1e   : > { %v232_v35 = vsel %vm224_vm0, %v230_v32, %v231_v33  ;;  %v1494_v42 = vsel %vm224_vm0, %v251_v31, %v253_v38  ;;  %v234_v43 = vsel %vm224_vm0, %v231_v33, %v233_v39  ;;  %v294_v48 = vrot.slane %v187_v36, 2  ;;  %1208 = vmatprep.subr.msk.mxu0 %vm906_vm2, %v856_v12  ;;  %1242 = vmatprep.subr.msk.mxu1 %vm906_vm2, %v856_v12  ;;  %v854_v18 = vld [vmem:[%s2085_s1 + $0x10] sm:$0xff]  ;;  %v853_v19 = vld [vmem:[%s2085_s1 + $0x8] sm:$0xff]  ;;  %s2127_s19 = smov (!%p160_p6, %s1163_s19), 31 }
  0x1f   : > { %2097 = vst [vmem:[#allocation3_spill] sm:$0xff] %v1494_v42  ;;  %v1503_v46 = vsel %vm265_vm1, %v291_v40, %v292_v41  ;;  %v273_v47 = vsel %vm265_vm1, %v271_v44, %v272_v45  ;;  %v274_v49 = vrot.slane %v175_v37, 2  ;;  %v255_v56 = vrot.slane %v1523_v52, 1  ;;  %1209 = vmatpush3.msk.msra.mxu0 %vm906_vm2, %v856_v12  ;;  %1247 = vmatpush3.msk.msra.mxu1 %vm906_vm2, %v856_v12  ;;  %v1609_v31 = vld [vmem:[%s1403_s21 + $0xa8] sm:$0xff]  ;;  %v1633_v40 = vld [vmem:[%s1403_s21 + $0xb0] sm:$0xff] }
  0x20   : > { %2098 = vst [vmem:[#allocation4_spill] sm:$0xff] %v1503_v46  ;;  %v1516_v50 = vsel %vm265_vm1, %v292_v41, %v294_v48  ;;  %v256_v57 = vrot.slane %v1536_v54, 1  ;;  %v235_v58 = vrot.slane %v1526_v53, 1  ;;  %v236_v59 = vrot.slane %v1539_v55, 1  ;;  %1210 = vmatprep.subr.mxu0 %v855_v13  ;;  %1243 = vmatprep.subr.mxu1 %v855_v13  ;;  %2101 = vst [vmem:[#allocation7_spill] sm:$0xff] %v1609_v31  ;;  %v1612_v32 = vld [vmem:[%s1403_s21 + $0x48] sm:$0xff] }
  0x21   : > { %396 = vrot.lane.b32.xlu1 %v1442_v20, %s1342_s23  ;;  %380 = vrot.lane.b32.xlu0 %v268_v21, %s1342_s23  ;;  %2099 = vst [vmem:[#allocation5_spill] sm:$0xff] %v1516_v50  ;;  %v275_v51 = vsel %vm265_vm1, %v272_v45, %v274_v49  ;;  %v258_v1 = vrot.slane %v190_v62, 1  ;;  %v238_v3 = vrot.slane %v178_v63, 1  ;;  %v296_v4 = vrot.slane %v1523_v52, 2  ;;  %v852_v21 = vld [vmem:[%s2085_s1] sm:$0xff]  ;;  %2102 = vst [vmem:[#allocation8_spill] sm:$0xff] %v1612_v32 }
  0x22   : > { %v257_v60 = vsel %vm224_vm0, %v255_v56, %v256_v57  ;;  %v237_v61 = vsel %vm224_vm0, %v235_v58, %v236_v59  ;;  %v297_v5 = vrot.slane %v1536_v54, 2  ;;  %v276_v7 = vrot.slane %v1526_v53, 2  ;;  %1211 = vmatpush3.msra.mxu0 %v855_v13  ;;  %1248 = vmatpush3.msra.mxu1 %v855_v13  ;;  %2103 = vst [vmem:[#allocation9_spill] sm:$0xff] %v1633_v40  ;;  %v1636_v41 = vld [vmem:[%s1403_s21 + $0x50] sm:$0xff] }
  0x23   : > { %v259_v8 = vsel %vm224_vm0, %v256_v57, %v258_v1  ;;  %v239_v9 = vsel %vm224_vm0, %v236_v59, %v238_v3  ;;  %v277_v11 = vrot.slane %v1539_v55, 2  ;;  %1212 = vmatprep.subr.mxu0 %v854_v18  ;;  %1244 = vmatprep.subr.mxu1 %v854_v18  ;;  %v299_v22 = vrot.slane %v190_v62, 2  ;;  %2104 = vst [vmem:[#allocation10_spill] sm:$0xff] %v1636_v41  ;;  %v193_v59 = vld [vmem:[%s1403_s21 + $0xb8] sm:$0x3] }
  0x24   : > { %v298_v14 = vsel %vm265_vm1, %v296_v4, %v297_v5  ;;  %1213 = vmatpush3.msra.mxu0 %v854_v18  ;;  %1249 = vmatpush3.msra.mxu1 %v854_v18  ;;  %v279_v23 = vrot.slane %v178_v63, 2  ;;  %v261_v44 = vrot.slane %v1633_v40, 1  ;;  %v240_v45 = vrot.slane %v1612_v32, 1 }
  0x25   : > { %398 = vrot.lane.b32.xlu1 %v1449_v24, %s1342_s23  ;;  %382 = vrot.lane.b32.xlu0 %v270_v25, %s1342_s23  ;;  %v278_v15 = vsel %vm265_vm1, %v276_v7, %v277_v11  ;;  %v300_v25 = vsel %vm265_vm1, %v297_v5, %v299_v22  ;;  %v263_v63 = vrot.slane %v193_v59, 1  ;;  %v282_v12 = vrot.slane %v1636_v41, 2 }
  0x26   : > { %1214 = vmatprep.subr.mxu0 %v853_v19  ;;  %1245 = vmatprep.subr.mxu1 %v853_v19  ;;  %v280_v30 = vsel %vm265_vm1, %v277_v11, %v279_v23  ;;  %v281_v11 = vrot.slane %v1612_v32, 2 }
  0x27   : > { %1215 = vmatpush3.msra.mxu0 %v853_v19  ;;  %1250 = vmatpush3.msra.mxu1 %v853_v19  ;;  %v264_v5 = vsel %vm224_vm0, %v261_v44, %v263_v63 }
  0x28   : > { %1216 = vmatprep.subr.mxu0 %v852_v21  ;;  %1246 = vmatprep.subr.mxu1 %v852_v21  ;;  %v283_v18 = vsel %vm265_vm1, %v281_v11, %v282_v12 }
  0x29   : > { %444 = vrot.lane.b32.xlu1 %v1456_v26, %s1343_s24  ;;  %428 = vrot.lane.b32.xlu0 %v1459_v27, %s1343_s24 }
  0x2a   : > { %1217 = vmatpush3.msra.mxu0 %v852_v21  ;;  %1251 = vmatpush3.msra.mxu1 %v852_v21 }
  0x2d   : > { %446 = vrot.lane.b32.xlu1 %v1462_v28, %s1343_s24  ;;  %430 = vrot.lane.b32.xlu0 %v1465_v29, %s1343_s24 }
  0x31   : > { %492 = vrot.lane.b32.xlu1 %v1480_v34, %s1344_s25  ;;  %476 = vrot.lane.b32.xlu0 %v232_v35, %s1344_s25 }
  0x35   : > { %352 = vrot.lane.b32.xlu1 %v1480_v34, %s1341_s22  ;;  %336 = vrot.lane.b32.xlu0 %v232_v35, %s1341_s22 }
  0x39   : > { %494 = vrot.lane.b32.xlu1 %v1494_v42, %s1344_s25  ;;  %478 = vrot.lane.b32.xlu0 %v234_v43, %s1344_s25 }
  0x3d   : > { %540 = vrot.lane.b32.xlu1 %v1503_v46, %s1345_s26  ;;  %524 = vrot.lane.b32.xlu0 %v273_v47, %s1345_s26 }
  0x41   : > { %354 = vrot.lane.b32.xlu1 %v1494_v42, %s1341_s22  ;;  %338 = vrot.lane.b32.xlu0 %v234_v43, %s1341_s22  ;;  %v260_v43 = vrot.slane %v1609_v31, 1 }
  0x45   : > { %400 = vrot.lane.b32.xlu1 %v1503_v46, %s1342_s23  ;;  %384 = vrot.lane.b32.xlu0 %v273_v47, %s1342_s23  ;;  %v241_v47 = vrot.slane %v1636_v41, 1 }
  0x47   : > { %v242_v56 = vsel %vm224_vm0, %v240_v45, %v241_v47 }
  0x49   : > { %542 = vrot.lane.b32.xlu1 %v1516_v50, %s1345_s26  ;;  %526 = vrot.lane.b32.xlu0 %v275_v51, %s1345_s26 }
  0x4d   : > { %588 = vrot.lane.b32.xlu1 %v1523_v52, %s1346_s27  ;;  %572 = vrot.lane.b32.xlu0 %v1526_v53, %s1346_s27 }
  0x51   : > { %402 = vrot.lane.b32.xlu1 %v1516_v50, %s1342_s23  ;;  %386 = vrot.lane.b32.xlu0 %v275_v51, %s1342_s23  ;;  %v262_v51 = vsel %vm224_vm0, %v260_v43, %v261_v44  ;;  %v304_v43 = vrot.slane %v193_v59, 2 }
  0x55   : > { %448 = vrot.lane.b32.xlu1 %v1523_v52, %s1343_s24  ;;  %432 = vrot.lane.b32.xlu0 %v1526_v53, %s1343_s24 }
  0x59   : > { %590 = vrot.lane.b32.xlu1 %v1536_v54, %s1346_s27  ;;  %574 = vrot.lane.b32.xlu0 %v1539_v55, %s1346_s27 }
  0x5d   : > { %636 = vrot.lane.b32.xlu1 %v257_v60, %s1347_s28  ;;  %620 = vrot.lane.b32.xlu0 %v237_v61, %s1347_s28 }
  0x61   : > { %450 = vrot.lane.b32.xlu1 %v1536_v54, %s1343_s24  ;;  %434 = vrot.lane.b32.xlu0 %v1539_v55, %s1343_s24 }
  0x65   : > { %496 = vrot.lane.b32.xlu1 %v257_v60, %s1344_s25  ;;  %480 = vrot.lane.b32.xlu0 %v237_v61, %s1344_s25 }
  0x69   : > { %638 = vrot.lane.b32.xlu1 %v259_v8, %s1347_s28  ;;  %622 = vrot.lane.b32.xlu0 %v239_v9, %s1347_s28 }
  0x6d   : > { %684 = vrot.lane.b32.xlu1 %v298_v14, %s1348_s16  ;;  %668 = vrot.lane.b32.xlu0 %v278_v15, %s1348_s16 }
  0x71   : > { %356 = vrot.lane.b32.xlu1 %v257_v60, %s1341_s22  ;;  %340 = vrot.lane.b32.xlu0 %v237_v61, %s1341_s22  ;;  %v181_v60 = vld [vmem:[%s1403_s21 + $0x58] sm:$0x3] }
  0x72   : > { %v243_v1 = vrot.slane %v181_v60, 1  ;;  %v284_v44 = vrot.slane %v181_v60, 2 }
  0x74   : > { %v244_v7 = vsel %vm224_vm0, %v241_v47, %v243_v1 }
  0x75   : > { %498 = vrot.lane.b32.xlu1 %v259_v8, %s1344_s25  ;;  %482 = vrot.lane.b32.xlu0 %v239_v9, %s1344_s25 }
  0x79   : > { %544 = vrot.lane.b32.xlu1 %v298_v14, %s1345_s26  ;;  %528 = vrot.lane.b32.xlu0 %v278_v15, %s1345_s26 }
  0x7d   : > { %686 = vrot.lane.b32.xlu1 %v300_v25, %s1348_s16  ;;  %670 = vrot.lane.b32.xlu0 %v280_v30, %s1348_s16 }
  0x81   : > { %358 = vrot.lane.b32.xlu1 %v259_v8, %s1341_s22  ;;  %342 = vrot.lane.b32.xlu0 %v239_v9, %s1341_s22  ;;  %v301_v8 = vrot.slane %v1609_v31, 2  ;;  %v302_v9 = vrot.slane %v1633_v40, 2 }
  0x85   : > { %404 = vrot.lane.b32.xlu1 %v298_v14, %s1342_s23  ;;  %388 = vrot.lane.b32.xlu0 %v278_v15, %s1342_s23  ;;  %v303_v15 = vsel %vm265_vm1, %v301_v8, %v302_v9 }
  0x89   : > { %546 = vrot.lane.b32.xlu1 %v300_v25, %s1345_s26  ;;  %530 = vrot.lane.b32.xlu0 %v280_v30, %s1345_s26 }
  0x8b   : > { %v1614_v33 = vpop.permute.xlu1 %334  ;;  %v1616_v35 = vpop.permute.xlu0 %332 }
  0x8d   : > { %592 = vrot.lane.b32.xlu1 %v1609_v31, %s1346_s27  ;;  %576 = vrot.lane.b32.xlu0 %v1612_v32, %s1346_s27 }
  0x8f   : > { %v1622_v36 = vpop.permute.xlu1 %350  ;;  %v1624_v37 = vpop.permute.xlu0 %348 }
  0x91   : > { %406 = vrot.lane.b32.xlu1 %v300_v25, %s1342_s23  ;;  %390 = vrot.lane.b32.xlu0 %v280_v30, %s1342_s23 }
  0x93   : > { %v1628_v38 = vpop.permute.xlu1 %396  ;;  %v1630_v39 = vpop.permute.xlu0 %380 }
  0x95   : > { %452 = vrot.lane.b32.xlu1 %v1609_v31, %s1343_s24  ;;  %436 = vrot.lane.b32.xlu0 %v1612_v32, %s1343_s24 }
  0x97   : > { %v1646_v48 = vpop.permute.xlu1 %398  ;;  %v1648_v49 = vpop.permute.xlu0 %382 }
  0x99   : > { %594 = vrot.lane.b32.xlu1 %v1633_v40, %s1346_s27  ;;  %578 = vrot.lane.b32.xlu0 %v1636_v41, %s1346_s27 }
  0x9b   : > { %v1656_v57 = vpop.permute.xlu1 %444  ;;  %v1658_v58 = vpop.permute.xlu0 %428 }
  0x9d   : > { %640 = vrot.lane.b32.xlu1 %v262_v51, %s1347_s28  ;;  %624 = vrot.lane.b32.xlu0 %v242_v56, %s1347_s28 }
  0x9f   : > { %v1664_v61 = vpop.permute.xlu1 %446  ;;  %v1666_v62 = vpop.permute.xlu0 %430 }
  0xa1   : > { %454 = vrot.lane.b32.xlu1 %v1633_v40, %s1343_s24  ;;  %438 = vrot.lane.b32.xlu0 %v1636_v41, %s1343_s24  ;;  %v1748_v40 = vld [vmem:[%s1403_s21 + $0xc8] sm:$0xff] }
  0xa2   : > { %v310_v46 = vrot.slane %v1748_v40, 1 }
  0xa3   : > { %v1672_v3 = vpop.permute.xlu1 %492  ;;  %v1674_v4 = vpop.permute.xlu0 %476 }
  0xa5   : > { %500 = vrot.lane.b32.xlu1 %v262_v51, %s1344_s25  ;;  %484 = vrot.lane.b32.xlu0 %v242_v56, %s1344_s25 }
  0xa7   : > { %v353_v13 = vpop.permute.xlu1 %352  ;;  %v337_v14 = vpop.permute.xlu0 %336 }
  0xa8   : > { %v727_v32 = vsel %vm716_vm3, %v1456_v26, %v353_v13  ;;  %v719_v31 = vsel %vm716_vm3, %v1459_v27, %v337_v14 }
  0xa9   : > { %642 = vrot.lane.b32.xlu1 %v264_v5, %s1347_s28  ;;  %626 = vrot.lane.b32.xlu0 %v244_v7, %s1347_s28 }
  0xab   : > { %v1688_v19 = vpop.permute.xlu1 %494  ;;  %v1690_v21 = vpop.permute.xlu0 %478 }
  0xad   : > { %688 = vrot.lane.b32.xlu1 %v303_v15, %s1348_s16  ;;  %672 = vrot.lane.b32.xlu0 %v283_v18, %s1348_s16 }
  0xaf   : > { %v1694_v22 = vpop.permute.xlu1 %540  ;;  %v1696_v23 = vpop.permute.xlu0 %524 }
  0xb1   : > { %360 = vrot.lane.b32.xlu1 %v262_v51, %s1341_s22  ;;  %344 = vrot.lane.b32.xlu0 %v242_v56, %s1341_s22  ;;  %v305_v51 = vsel %vm265_vm1, %v302_v9, %v304_v43  ;;  %v285_v56 = vsel %vm265_vm1, %v282_v12, %v284_v44  ;;  %v1731_v43 = vld [vmem:[%s1403_s21 + $0xc0] sm:$0xff] }
  0xb2   : > { %v309_v50 = vrot.slane %v1731_v43, 1 }
  0xb3   : > { %v1700_v25 = vpop.permute.xlu1 %354  ;;  %v1702_v30 = vpop.permute.xlu0 %338 }
  0xb5   : > { %502 = vrot.lane.b32.xlu1 %v264_v5, %s1344_s25  ;;  %486 = vrot.lane.b32.xlu0 %v244_v7, %s1344_s25 }
  0xb7   : > { %v401_v45 = vpop.permute.xlu1 %400  ;;  %v385_v47 = vpop.permute.xlu0 %384 }
  0xb9   : > { %548 = vrot.lane.b32.xlu1 %v303_v15, %s1345_s26  ;;  %532 = vrot.lane.b32.xlu0 %v283_v18, %s1345_s26 }
  0xbb   : > { %v1710_v63 = vpop.permute.xlu1 %542  ;;  %v1712_v1 = vpop.permute.xlu0 %526 }
  0xbd   : > { %690 = vrot.lane.b32.xlu1 %v305_v51, %s1348_s16  ;;  %674 = vrot.lane.b32.xlu0 %v285_v56, %s1348_s16 }
  0xbf   : > { %v1716_v59 = vpop.permute.xlu1 %588  ;;  %v1718_v60 = vpop.permute.xlu0 %572 }
  0xc1   : > { %362 = vrot.lane.b32.xlu1 %v264_v5, %s1341_s22  ;;  %346 = vrot.lane.b32.xlu0 %v244_v7, %s1341_s22 }
  0xc3   : > { %v1722_v8 = vpop.permute.xlu1 %402  ;;  %v1724_v9 = vpop.permute.xlu0 %386 }
  0xc5   : > { %408 = vrot.lane.b32.xlu1 %v303_v15, %s1342_s23  ;;  %392 = vrot.lane.b32.xlu0 %v283_v18, %s1342_s23 }
  0xc7   : > { %v449_v11 = vpop.permute.xlu1 %448  ;;  %v433_v12 = vpop.permute.xlu0 %432 }
  0xc9   : > { %550 = vrot.lane.b32.xlu1 %v305_v51, %s1345_s26  ;;  %534 = vrot.lane.b32.xlu0 %v285_v56, %s1345_s26 }
  0xcb   : > { %v1733_v5 = vpop.permute.xlu1 %590  ;;  %v1735_v7 = vpop.permute.xlu0 %574 }
  0xcd   : > { %596 = vrot.lane.b32.xlu1 %v1731_v43, %s1346_s27  ;;  %580 = vrot.lane.b32.xlu0 %v1420_v10, %s1346_s27 }
  0xcf   : > { %v637_v15 = vpop.permute.xlu1 %636  ;;  %v621_v18 = vpop.permute.xlu0 %620 }
  0xd1   : > { %410 = vrot.lane.b32.xlu1 %v305_v51, %s1342_s23  ;;  %394 = vrot.lane.b32.xlu0 %v285_v56, %s1342_s23  ;;  %v744_v51 = vsel %vm733_vm4, %v727_v32, %v401_v45  ;;  %v736_v56 = vsel %vm733_vm4, %v719_v31, %v385_v47  ;;  %v717_v31 = vsel %vm716_vm3, %v1410_v2, %v1616_v35 }
  0xd2   : > { %v761_v13 = vsel %vm750_vm5, %v744_v51, %v449_v11  ;;  %v753_v42 = vsel %vm750_vm5, %v736_v56, %v433_v12  ;;  %v725_v32 = vsel %vm716_vm3, %v1420_v10, %v1624_v37  ;;  %v311_v47 = vsel %vm224_vm0, %v309_v50, %v310_v46 }
  0xd3   : > { %v1743_v44 = vpop.permute.xlu1 %450  ;;  %v1745_v41 = vpop.permute.xlu0 %434  ;;  %v742_v45 = vsel %vm733_vm4, %v725_v32, %v1628_v38  ;;  %v315_v32 = vrot.slane %v1748_v40, 2 }
  0xd4   : > { %v759_v2 = vsel %vm750_vm5, %v742_v45, %v1656_v57 }
  0xd5   : > { %456 = vrot.lane.b32.xlu1 %v1731_v43, %s1343_s24  ;;  %440 = vrot.lane.b32.xlu0 %v1420_v10, %s1343_s24  ;;  %v776_v11 = vsel %vm767_vm6, %v759_v2, %v1672_v3 }
  0xd6   : > { %v793_v50 = vsel %vm784_vm7, %v776_v11, %v1694_v22 }
  0xd7   : > { %v497_v27 = vpop.permute.xlu1 %496  ;;  %v481_v14 = vpop.permute.xlu0 %480  ;;  %v810_v57 = vsel %vm801_vm8, %v793_v50, %v1716_v59 }
  0xd8   : > { %v1765_v34 = vsel %vm767_vm6, %v761_v13, %v497_v27  ;;  %v1768_v55 = vsel %vm767_vm6, %v753_v42, %v481_v14  ;;  %v734_v42 = vsel %vm733_vm4, %v717_v31, %v1630_v39  ;;  %v827_v3 = vsel %vm818_vm9, %v810_v57, %v637_v15 }
  0xd9   : > { %598 = vrot.lane.b32.xlu1 %v1748_v40, %s1346_s27  ;;  %582 = vrot.lane.b32.xlu0 %v1415_v6, %s1346_s27  ;;  %v751_v10 = vsel %vm750_vm5, %v734_v42, %v1658_v58  ;;  %v720_v13 = vsel %vm716_vm3, %v1465_v29, %v1702_v30  ;;  %v314_v27 = vrot.slane %v1731_v43, 2 }
  0xda   : > { %v768_v38 = vsel %vm767_vm6, %v751_v10, %v1674_v4  ;;  %v737_v31 = vsel %vm733_vm4, %v720_v13, %v1724_v9 }
  0xdb   : > { %v639_v35 = vpop.permute.xlu1 %638  ;;  %v623_v37 = vpop.permute.xlu0 %622  ;;  %v785_v39 = vsel %vm784_vm7, %v768_v38, %v1696_v23  ;;  %v196_v23 = vld [vmem:[%s1403_s21 + $0xd0] sm:$0x3]  ;;  %v754_v30 = vsel %vm750_vm5, %v737_v31, %v1745_v41 }
  0xdc   : > { %v802_v58 = vsel %vm801_vm8, %v785_v39, %v1718_v60  ;;  %v312_v59 = vrot.slane %v196_v23, 1 }
  0xdd   : > { %644 = vrot.lane.b32.xlu1 %v311_v47, %s1347_s28  ;;  %628 = vrot.lane.b32.xlu0 %v1433_v17, %s1347_s28  ;;  %v819_v4 = vsel %vm818_vm9, %v802_v58, %v621_v18  ;;  %v728_v18 = vsel %vm716_vm3, %v1462_v28, %v1700_v25 }
  0xde   : > { %v745_v14 = vsel %vm733_vm4, %v728_v18, %v1722_v8  ;;  %v313_v25 = vsel %vm224_vm0, %v310_v46, %v312_v59  ;;  %v726_v46 = vsel %vm716_vm3, %v1415_v6, %v1622_v36 }
  0xdf   : > { %v685_v22 = vpop.permute.xlu1 %684  ;;  %v669_v12 = vpop.permute.xlu0 %668  ;;  %v762_v29 = vsel %vm750_vm5, %v745_v14, %v1743_v44  ;;  %v316_v44 = vsel %vm265_vm1, %v314_v27, %v315_v32 }
  0xe0   : > { %v844_v51 = vsel %vm835_vm10, %v827_v3, %v685_v22  ;;  %v836_v56 = vsel %vm835_vm10, %v819_v4, %v669_v12  ;;  %v198_v4 = vld [vmem:[%s1403_s21 + $0xe0] sm:$0xff] }
  0xe1   : > { %458 = vrot.lane.b32.xlu1 %v1748_v40, %s1343_s24  ;;  %1230 = vmatprep.mubr.msk.f32.mxu1 %vm857_vm11, %v844_v51  ;;  %v743_v40 = vsel %vm733_vm4, %v726_v46, %v1646_v48  ;;  %v323_v12 = vrot.slane %v198_v4, 1  ;;  %v2105_v51 = vld [vmem:[#allocation6_spill] sm:$0xff] }
  0xe2   : > { %442 = vrot.lane.b32.xlu0 %v1415_v6, %s1343_s24  ;;  %1218 = vmatprep.mubr.msk.f32.mxu0 %vm857_vm11, %v836_v56 }
  0xe3   : > { %v357_v60 = vpop.permute.xlu1 %356  ;;  %v341_v15 = vpop.permute.xlu0 %340 }
  0xe4   : > { %v729_v11 = vsel %vm716_vm3, %v1523_v52, %v357_v60  ;;  %v197_v52 = vld [vmem:[%s1403_s21 + $0xd8] sm:$0xff] }
  0xe5   : > { %504 = vrot.lane.b32.xlu1 %v311_v47, %s1344_s25  ;;  %v322_v22 = vrot.slane %v197_v52, 1 }
  0xe6   : > { %488 = vrot.lane.b32.xlu0 %v1433_v17, %s1344_s25  ;;  %v718_v17 = vsel %vm716_vm3, %v1406_v0, %v1614_v33  ;;  %v760_v0 = vsel %vm750_vm5, %v743_v40, %v1664_v61 }
  0xe7   : > { %v499_v43 = vpop.permute.xlu1 %498  ;;  %v483_v45 = vpop.permute.xlu0 %482  ;;  %v735_v41 = vsel %vm733_vm4, %v718_v17, %v1648_v49  ;;  %v777_v48 = vsel %vm767_vm6, %v760_v0, %v1688_v19 }
  0xe8   : > { %v1836_v8 = vsel %vm767_vm6, %v762_v29, %v499_v43  ;;  %v1839_v9 = vsel %vm767_vm6, %v754_v30, %v483_v45  ;;  %v752_v33 = vsel %vm750_vm5, %v735_v41, %v1666_v62  ;;  %v794_v42 = vsel %vm784_vm7, %v777_v48, %v1710_v63  ;;  %v2106_v29 = vld [vmem:[#allocation2_spill] sm:$0xff]  ;;  %v2107_v45 = vld [vmem:[#allocation3_spill] sm:$0xff] }
  0xe9   : > { %646 = vrot.lane.b32.xlu1 %v313_v25, %s1347_s28  ;;  %v769_v49 = vsel %vm767_vm6, %v752_v33, %v1690_v21  ;;  %v811_v61 = vsel %vm801_vm8, %v794_v42, %v1733_v5  ;;  %v317_v5 = vrot.slane %v196_v23, 2 }
  0xea   : > { %630 = vrot.lane.b32.xlu0 %v1430_v16, %s1347_s28  ;;  %v786_v47 = vsel %vm784_vm7, %v769_v49, %v1712_v1  ;;  %v828_v19 = vsel %vm818_vm9, %v811_v61, %v639_v35 }
  0xeb   : > { %v1859_v6 = vpop.permute.xlu1 %544  ;;  %v1861_v36 = vpop.permute.xlu0 %528  ;;  %v803_v62 = vsel %vm801_vm8, %v786_v47, %v1735_v7  ;;  %v2109_v47 = vld [vmem:[#allocation5_spill] sm:$0xff] }
  0xec   : > { %v820_v21 = vsel %vm818_vm9, %v803_v62, %v623_v37  ;;  %v318_v37 = vsel %vm265_vm1, %v315_v32, %v317_v5  ;;  %v327_v32 = vrot.slane %v197_v52, 2 }
  0xed   : > { %692 = vrot.lane.b32.xlu1 %v316_v44, %s1348_s16 }
  0xee   : > { %676 = vrot.lane.b32.xlu0 %v1442_v20, %s1348_s16 }
  0xef   : > { %v687_v2 = vpop.permute.xlu1 %686  ;;  %v671_v63 = vpop.permute.xlu0 %670 }
  0xf0   : > { %v845_v10 = vsel %vm835_vm10, %v828_v19, %v687_v2  ;;  %v837_v1 = vsel %vm835_vm10, %v820_v21, %v671_v63 }
  0xf1   : > { %506 = vrot.lane.b32.xlu1 %v313_v25, %s1344_s25  ;;  %1231 = vmatmul.mubr.msk.f32.vlgmr.msra.gmra.mxu1 %vm857_vm11, %v845_v10  ;;  %v328_v25 = vrot.slane %v198_v4, 2  ;;  %v795_v10 = vsel %vm784_vm7, %v1765_v34, %v1859_v6 }
  0xf2   : > { %490 = vrot.lane.b32.xlu0 %v1430_v16, %s1344_s25  ;;  %1219 = vmatmul.mubr.msk.f32.vlgmr.msra.gmra.mxu0 %vm857_vm11, %v837_v1  ;;  %v721_v16 = vsel %vm716_vm3, %v1526_v53, %v341_v15  ;;  %v787_v1 = vsel %vm784_vm7, %v1768_v55, %v1861_v36 }
  0xf3   : > { %v359_v7 = vpop.permute.xlu1 %358  ;;  %v343_v35 = vpop.permute.xlu0 %342  ;;  %v329_v17 = vsel %vm265_vm1, %v327_v32, %v328_v25 }
  0xf4   : > { %v730_v23 = vsel %vm716_vm3, %v1536_v54, %v359_v7  ;;  %v722_v56 = vsel %vm716_vm3, %v2105_v51, %v343_v35 }
  0xf5   : > { %552 = vrot.lane.b32.xlu1 %v316_v44, %s1345_s26  ;;  %v2108_v44 = vld [vmem:[#allocation4_spill] sm:$0xff] }
  0xf6   : > { %536 = vrot.lane.b32.xlu0 %v1442_v20, %s1345_s26 }
  0xf7   : > { %v405_v38 = vpop.permute.xlu1 %404  ;;  %v389_v50 = vpop.permute.xlu0 %388 }
  0xf8   : > { %v746_v39 = vsel %vm733_vm4, %v729_v11, %v405_v38  ;;  %v738_v57 = vsel %vm733_vm4, %v721_v16, %v389_v50 }
  0xf9   : > { %694 = vrot.lane.b32.xlu1 %v318_v37, %s1348_s16 }
  0xfa   : > { %678 = vrot.lane.b32.xlu0 %v1449_v24, %s1348_s16 }
  0xfb   : > { %v1900_v20 = vpop.permute.xlu1 %546  ;;  %v1902_v58 = vpop.permute.xlu0 %530 }
  0xfd   : > { %554 = vrot.lane.b32.xlu1 %v318_v37, %s1345_s26 }
  0xfe   : > { %538 = vrot.lane.b32.xlu0 %v1449_v24, %s1345_s26  ;;  %v199_v24 = vld [vmem:[%s1403_s21 + $0xe8] sm:$0x3]  ;;  %s163_s21 = sadd.s32 %s1164_s20, %s2127_s19 }
  0xff   : > { %v593_v53 = vpop.permute.xlu1 %592  ;;  %v577_v3 = vpop.permute.xlu0 %576  ;;  %v325_v13 = vrot.slane %v199_v24, 1  ;;  %v330_v46 = vrot.slane %v199_v24, 2  ;;  %s1165_s22 = sshll.u32 %s163_s21, 3 }
 0x100   : > { %v812_v5 = vsel %vm801_vm8, %v795_v10, %v593_v53  ;;  %v804_v7 = vsel %vm801_vm8, %v787_v1, %v577_v3  ;;  %v796_v3 = vsel %vm784_vm7, %v1836_v8, %v1900_v20  ;;  %v2110_v20 = vld [vmem:[#allocation7_spill] sm:$0xff]  ;;  %s2051_s25 = scalar_lea.vmem %s2086_s2, %s1165_s22 }
 0x101   : > { %600 = vrot.lane.b32.xlu1 %v197_v52, %s1346_s27  ;;  %v326_v30 = vsel %vm224_vm0, %v323_v12, %v325_v13  ;;  %v331_v0 = vsel %vm265_vm1, %v328_v25, %v330_v46 }
 0x102   : > { %584 = vrot.lane.b32.xlu0 %v1456_v26, %s1346_s27  ;;  %v324_v26 = vsel %vm224_vm0, %v322_v22, %v323_v12 }
 0x103   : > { %v407_v59 = vpop.permute.xlu1 %406  ;;  %v391_v60 = vpop.permute.xlu0 %390 }
 0x104   : > { %v747_v15 = vsel %vm733_vm4, %v730_v23, %v407_v59  ;;  %v739_v18 = vsel %vm733_vm4, %v722_v56, %v391_v60 }
 0x105   : > { %602 = vrot.lane.b32.xlu1 %v198_v4, %s1346_s27  ;;  %v788_v4 = vsel %vm784_vm7, %v1839_v9, %v1902_v58 }
 0x106   : > { %586 = vrot.lane.b32.xlu0 %v1462_v28, %s1346_s27 }
 0x107   : > { %v453_v27 = vpop.permute.xlu1 %452  ;;  %v437_v54 = vpop.permute.xlu0 %436 }
 0x108   : > { %v763_v14 = vsel %vm750_vm5, %v746_v39, %v453_v27  ;;  %v755_v31 = vsel %vm750_vm5, %v738_v57, %v437_v54 }
 0x109   : > { %648 = vrot.lane.b32.xlu1 %v324_v26, %s1347_s28 }
 0x10a   : > { %632 = vrot.lane.b32.xlu0 %v2106_v29, %s1347_s28 }
 0x10b   : > { %v595_v43 = vpop.permute.xlu1 %594  ;;  %v579_v28 = vpop.permute.xlu0 %578 }
 0x10c   : > { %v813_v22 = vsel %vm801_vm8, %v796_v3, %v595_v43  ;;  %v805_v12 = vsel %vm801_vm8, %v788_v4, %v579_v28 }
 0x10d   : > { %650 = vrot.lane.b32.xlu1 %v326_v30, %s1347_s28 }
 0x10e   : > { %634 = vrot.lane.b32.xlu0 %v2107_v45, %s1347_s28 }
 0x10f   : > { %v641_v40 = vpop.permute.xlu1 %640  ;;  %v625_v41 = vpop.permute.xlu0 %624 }
 0x110   : > { %v829_v35 = vsel %vm818_vm9, %v812_v5, %v641_v40  ;;  %v821_v37 = vsel %vm818_vm9, %v804_v7, %v625_v41 }
 0x111   : > { %696 = vrot.lane.b32.xlu1 %v329_v17, %s1348_s16 }
 0x112   : > { %680 = vrot.lane.b32.xlu0 %v2108_v44, %s1348_s16 }
 0x113   : > { %v455_v33 = vpop.permute.xlu1 %454  ;;  %v439_v48 = vpop.permute.xlu0 %438 }
 0x114   : > { %v764_v49 = vsel %vm750_vm5, %v747_v15, %v455_v33  ;;  %v756_v42 = vsel %vm750_vm5, %v739_v18, %v439_v48  ;;  %v2111_v15 = vld [vmem:[#allocation8_spill] sm:$0xff] }
 0x115   : > { %698 = vrot.lane.b32.xlu1 %v331_v0, %s1348_s16 }
 0x116   : > { %682 = vrot.lane.b32.xlu0 %v2109_v47, %s1348_s16 }
 0x117   : > { %v501_v61 = vpop.permute.xlu1 %500  ;;  %v485_v62 = vpop.permute.xlu0 %484 }
 0x118   : > { %v1943_v19 = vsel %vm767_vm6, %v763_v14, %v501_v61  ;;  %v1946_v21 = vsel %vm767_vm6, %v755_v31, %v485_v62 }
 0x11b   : > { %v643_v2 = vpop.permute.xlu1 %642  ;;  %v627_v63 = vpop.permute.xlu0 %626 }
 0x11c   : > { %v830_v23 = vsel %vm818_vm9, %v813_v22, %v643_v2  ;;  %v822_v51 = vsel %vm818_vm9, %v805_v12, %v627_v63 }
 0x11f   : > { %v689_v11 = vpop.permute.xlu1 %688  ;;  %v673_v16 = vpop.permute.xlu0 %672 }
 0x120   : > { %v846_v38 = vsel %vm835_vm10, %v829_v35, %v689_v11  ;;  %v838_v50 = vsel %vm835_vm10, %v821_v37, %v673_v16 }
 0x121   : > { %1221 = vmatprep.mubr.msk.f32.mxu0 %vm857_vm11, %v838_v50  ;;  %1233 = vmatprep.mubr.msk.f32.mxu1 %vm857_vm11, %v846_v38 }
 0x123   : > { %v361_v34 = vpop.permute.xlu1 %360  ;;  %v345_v55 = vpop.permute.xlu0 %344 }
 0x124   : > { %v731_v58 = vsel %vm716_vm3, %v2110_v20, %v361_v34  ;;  %v723_v18 = vsel %vm716_vm3, %v2111_v15, %v345_v55 }
 0x127   : > { %v503_v6 = vpop.permute.xlu1 %502  ;;  %v487_v36 = vpop.permute.xlu0 %486 }
 0x128   : > { %v781_v39 = vsel %vm767_vm6, %v764_v49, %v503_v6  ;;  %v773_v57 = vsel %vm767_vm6, %v756_v42, %v487_v36 }
 0x12b   : > { %v549_v52 = vpop.permute.xlu1 %548  ;;  %v533_v53 = vpop.permute.xlu0 %532 }
 0x12c   : > { %v797_v42 = vsel %vm784_vm7, %v1943_v19, %v549_v52  ;;  %v789_v47 = vsel %vm784_vm7, %v1946_v21, %v533_v53 }
 0x12f   : > { %v691_v56 = vpop.permute.xlu1 %690  ;;  %v675_v59 = vpop.permute.xlu0 %674 }
 0x130   : > { %v847_v60 = vsel %vm835_vm10, %v830_v23, %v691_v56  ;;  %v839_v24 = vsel %vm835_vm10, %v822_v51, %v675_v59 }
 0x131   : > { %1222 = vmatmul.mubr.msk.f32.gmra.mxu0 %vm857_vm11, %v839_v24  ;;  %1234 = vmatmul.mubr.msk.f32.gmra.mxu1 %vm857_vm11, %v847_v60 }
 0x133   : > { %v1978_v8 = vpop.permute.xlu1 %362  ;;  %v1980_v9 = vpop.permute.xlu0 %346 }
 0x137   : > { %v409_v26 = vpop.permute.xlu1 %408  ;;  %v393_v13 = vpop.permute.xlu0 %392 }
 0x138   : > { %v748_v27 = vsel %vm733_vm4, %v731_v58, %v409_v26  ;;  %v740_v54 = vsel %vm733_vm4, %v723_v18, %v393_v13  ;;  %v2112_v58 = vld [vmem:[#allocation9_spill] sm:$0xff]  ;;  %v2113_v13 = vld [vmem:[#allocation10_spill] sm:$0xff] }
 0x139   : > { %v732_v15 = vsel %vm716_vm3, %v2112_v58, %v1978_v8 }
 0x13b   : > { %v551_v14 = vpop.permute.xlu1 %550  ;;  %v535_v31 = vpop.permute.xlu0 %534 }
 0x13c   : > { %v798_v11 = vsel %vm784_vm7, %v781_v39, %v551_v14  ;;  %v790_v16 = vsel %vm784_vm7, %v773_v57, %v535_v31  ;;  %v724_v14 = vsel %vm716_vm3, %v2113_v13, %v1980_v9 }
 0x13f   : > { %v597_v32 = vpop.permute.xlu1 %596  ;;  %v581_v25 = vpop.permute.xlu0 %580 }
 0x140   : > { %v814_v61 = vsel %vm801_vm8, %v797_v42, %v597_v32  ;;  %v806_v62 = vsel %vm801_vm8, %v789_v47, %v581_v25 }
 0x143   : > { %v411_v29 = vpop.permute.xlu1 %410  ;;  %v395_v30 = vpop.permute.xlu0 %394 }
 0x144   : > { %v741_v32 = vsel %vm733_vm4, %v724_v14, %v395_v30 }
 0x147   : > { %v457_v43 = vpop.permute.xlu1 %456  ;;  %v441_v28 = vpop.permute.xlu0 %440 }
 0x148   : > { %v765_v56 = vsel %vm750_vm5, %v748_v27, %v457_v43  ;;  %v757_v60 = vsel %vm750_vm5, %v740_v54, %v441_v28  ;;  %v749_v27 = vsel %vm733_vm4, %v732_v15, %v411_v29 }
 0x14b   : > { %v599_v45 = vpop.permute.xlu1 %598  ;;  %v583_v17 = vpop.permute.xlu0 %582 }
 0x14c   : > { %v815_v38 = vsel %vm801_vm8, %v798_v11, %v599_v45  ;;  %v807_v50 = vsel %vm801_vm8, %v790_v16, %v583_v17 }
 0x14f   : > { %v645_v46 = vpop.permute.xlu1 %644  ;;  %v629_v40 = vpop.permute.xlu0 %628 }
 0x150   : > { %v831_v2 = vsel %vm818_vm9, %v814_v61, %v645_v46  ;;  %v823_v10 = vsel %vm818_vm9, %v806_v62, %v629_v40 }
 0x153   : > { %v459_v41 = vpop.permute.xlu1 %458 }
 0x154   : > { %v443_v44 = vpop.permute.xlu0 %442  ;;  %v766_v25 = vsel %vm750_vm5, %v749_v27, %v459_v41 }
 0x155   : > { %v758_v45 = vsel %vm750_vm5, %v741_v32, %v443_v44 }
 0x157   : > { %v505_v0 = vpop.permute.xlu1 %504 }
 0x158   : > { %v489_v33 = vpop.permute.xlu0 %488  ;;  %v782_v24 = vsel %vm767_vm6, %v765_v56, %v505_v0 }
 0x159   : > { %v774_v18 = vsel %vm767_vm6, %v757_v60, %v489_v33 }
 0x15b   : > { %v647_v48 = vpop.permute.xlu1 %646 }
 0x15c   : > { %v631_v49 = vpop.permute.xlu0 %630  ;;  %v832_v34 = vsel %vm818_vm9, %v815_v38, %v647_v48 }
 0x15d   : > { %v824_v6 = vsel %vm818_vm9, %v807_v50, %v631_v49 }
 0x15f   : > { %v693_v63 = vpop.permute.xlu1 %692 }
 0x160   : > { %v848_v1 = vsel %vm835_vm10, %v831_v2, %v693_v63  ;;  %v677_v5 = vpop.permute.xlu0 %676 }
 0x161   : > { %v840_v7 = vsel %vm835_vm10, %v823_v10, %v677_v5  ;;  %1236 = vmatprep.mubr.msk.f32.mxu1 %vm857_vm11, %v848_v1 }
 0x162   : > { %1224 = vmatprep.mubr.msk.f32.mxu0 %vm857_vm11, %v840_v7 }
 0x163   : > { %v507_v19 = vpop.permute.xlu1 %506 }
 0x164   : > { %v491_v21 = vpop.permute.xlu0 %490  ;;  %v783_v17 = vsel %vm767_vm6, %v766_v25, %v507_v19 }
 0x165   : > { %v775_v40 = vsel %vm767_vm6, %v758_v45, %v491_v21 }
 0x167   : > { %v553_v35 = vpop.permute.xlu1 %552 }
 0x168   : > { %v537_v37 = vpop.permute.xlu0 %536  ;;  %v799_v26 = vsel %vm784_vm7, %v782_v24, %v553_v35 }
 0x169   : > { %v791_v31 = vsel %vm784_vm7, %v774_v18, %v537_v37 }
 0x16b   : > { %v695_v55 = vpop.permute.xlu1 %694 }
 0x16c   : > { %v849_v36 = vsel %vm835_vm10, %v832_v34, %v695_v55  ;;  %v679_v52 = vpop.permute.xlu0 %678 }
 0x16d   : > { %v841_v53 = vsel %vm835_vm10, %v824_v6, %v679_v52  ;;  %1237 = vmatmul.mubr.msk.f32.gmra.mxu1 %vm857_vm11, %v849_v36 }
 0x16e   : > { %1225 = vmatmul.mubr.msk.f32.gmra.mxu0 %vm857_vm11, %v841_v53 }
 0x16f   : > { %v555_v39 = vpop.permute.xlu1 %554 }
 0x170   : > { %v539_v57 = vpop.permute.xlu0 %538  ;;  %v800_v30 = vsel %vm784_vm7, %v783_v17, %v555_v39 }
 0x171   : > { %v792_v0 = vsel %vm784_vm7, %v775_v40, %v539_v57 }
 0x173   : > { %v601_v3 = vpop.permute.xlu1 %600 }
 0x174   : > { %v585_v4 = vpop.permute.xlu0 %584  ;;  %v816_v54 = vsel %vm801_vm8, %v799_v26, %v601_v3 }
 0x175   : > { %v808_v8 = vsel %vm801_vm8, %v791_v31, %v585_v4 }
 0x177   : > { %v603_v22 = vpop.permute.xlu1 %602 }
 0x178   : > { %v587_v12 = vpop.permute.xlu0 %586  ;;  %v817_v44 = vsel %vm801_vm8, %v800_v30, %v603_v22 }
 0x179   : > { %v809_v33 = vsel %vm801_vm8, %v792_v0, %v587_v12 }
 0x17b   : > { %v649_v23 = vpop.permute.xlu1 %648 }
 0x17c   : > { %v633_v51 = vpop.permute.xlu0 %632  ;;  %v833_v43 = vsel %vm818_vm9, %v816_v54, %v649_v23 }
 0x17d   : > { %v825_v9 = vsel %vm818_vm9, %v808_v8, %v633_v51 }
 0x17f   : > { %v651_v59 = vpop.permute.xlu1 %650 }
 0x180   : > { %v635_v20 = vpop.permute.xlu0 %634  ;;  %v834_v48 = vsel %vm818_vm9, %v817_v44, %v651_v59 }
 0x181   : > { %v826_v42 = vsel %vm818_vm9, %v809_v33, %v635_v20 }
 0x183   : > { %v697_v28 = vpop.permute.xlu1 %696 }
 0x184   : > { %v850_v29 = vsel %vm835_vm10, %v833_v43, %v697_v28  ;;  %v681_v46 = vpop.permute.xlu0 %680 }
 0x185   : > { %v842_v41 = vsel %vm835_vm10, %v825_v9, %v681_v46  ;;  %1239 = vmatprep.mubr.msk.f32.mxu1 %vm857_vm11, %v850_v29 }
 0x186   : > { %1227 = vmatprep.mubr.msk.f32.mxu0 %vm857_vm11, %v842_v41 }
 0x187   : > { %v699_v49 = vpop.permute.xlu1 %698 }
 0x188   : > { %v851_v47 = vsel %vm835_vm10, %v834_v48, %v699_v49  ;;  %v683_v61 = vpop.permute.xlu0 %682 }
 0x189   : > { %v843_v62 = vsel %vm835_vm10, %v826_v42, %v683_v61  ;;  %1240 = vmatmul.mubr.msk.f32.gmra.mxu1 %vm857_vm11, %v851_v47 }
 0x18a   : > { %1228 = vmatmul.mubr.msk.f32.gmra.mxu0 %vm857_vm11, %v843_v62 }
 0x1b1   : > { %v1232_v2 = vpop.f32.mrf.mxu1 }
 0x1b2   : > { %v1220_v63 = vpop.f32.mrf.mxu0  ;;  %1064 = vst [vmem:[%s2051_s25 + $0x48] sm:$0xff] %v1232_v2 }
 0x1b3   : > { %1056 = vst [vmem:[%s2051_s25 + $0x8] sm:$0xff] %v1220_v63  ;;  %v1016_v10 = vpop.f32.mrf.mxu1 }
 0x1b4   : > { %v976_v1 = vpop.f32.mrf.mxu0  ;;  %1063 = vst [vmem:[%s2051_s25 + $0x40] sm:$0xff] %v1016_v10 }
 0x1b5   : > { %1055 = vst [vmem:[%s2051_s25] sm:$0xff] %v976_v1 }
 0x1f1   : > { %v1223_v5 = vpop.f32.mrf.mxu0  ;;  %v1235_v7 = vpop.f32.mrf.mxu1 }
 0x1f2   : > { %1058 = vst [vmem:[%s2051_s25 + $0x18] sm:$0xff] %v1223_v5  ;;  %1066 = vst [vmem:[%s2051_s25 + $0x58] sm:$0xff] %v1235_v7 }
 0x1f3   : > { %v986_v19 = vpop.f32.mrf.mxu0  ;;  %v1026_v21 = vpop.f32.mrf.mxu1 }
 0x1f4   : > { %1057 = vst [vmem:[%s2051_s25 + $0x10] sm:$0xff] %v986_v19  ;;  %1065 = vst [vmem:[%s2051_s25 + $0x50] sm:$0xff] %v1026_v21 }
 0x22d   : > { %v1238_v35 = vpop.f32.mrf.mxu1 }
 0x22e   : > { %v1226_v37 = vpop.f32.mrf.mxu0  ;;  %1068 = vst [vmem:[%s2051_s25 + $0x68] sm:$0xff] %v1238_v35 }
 0x22f   : > { %1060 = vst [vmem:[%s2051_s25 + $0x28] sm:$0xff] %v1226_v37  ;;  %v1036_v11 = vpop.f32.mrf.mxu1 }
 0x230   : > { %v996_v16 = vpop.f32.mrf.mxu0  ;;  %1067 = vst [vmem:[%s2051_s25 + $0x60] sm:$0xff] %v1036_v11 }
 0x231   : > { %1059 = vst [vmem:[%s2051_s25 + $0x20] sm:$0xff] %v996_v16 }
 0x249   : > { %v1241_v38 = vpop.f32.mrf.mxu1 }
 0x24a   : > { %v1229_v50 = vpop.f32.mrf.mxu0  ;;  %1070 = vst [vmem:[%s2051_s25 + $0x78] sm:$0xff] %v1241_v38 }
 0x24b   : > { %1062 = vst [vmem:[%s2051_s25 + $0x38] sm:$0xff] %v1229_v50  ;;  %v1046_v34 = vpop.f32.mrf.mxu1 }
 0x24c   : > { %v1006_v55 = vpop.f32.mrf.mxu0  ;;  %1069 = vst [vmem:[%s2051_s25 + $0x70] sm:$0xff] %v1046_v34 }
 0x24d   : > { %1061 = vst [vmem:[%s2051_s25 + $0x30] sm:$0xff] %v1006_v55 }
 0x24e PF: > { %s12_s13 = sadd.s32 1, %s1339_s13   ;;  %s2114_s9 = smov %s1331_s11 }
 0x24f   : > { %p9_p7 = scmp.ge.s32.totalorder %s12_s13, 6   ;;  %s2115_s10 = smov %s1335_s12 }
 0x250   : > { %s2116_s11 = smov %s2119_s14  ;;  %s2117_s12 = smov %s2123_s15 }
 0x251   :  { %11 = sbr.rel (!%p9_p7) target bundleno = 3 (0x3), region = 59 }

</bundles_post_ra>
